<compile_context>
chip_gen: v5e
topology: v5e:2x2
jax: 0.10.0
libtpu: 0.0.40
codegen_flags: <defaults>
</compile_context>

<pallas_src>
import functools

import jax
import jax.numpy as jnp
from jax.experimental import pallas as pl
from jax.experimental.pallas import tpu as pltpu

_HALO = 128            # lane width of the halo block (one 128-lane group)
_DEFAULT_L_TILE = 512  # multiple of 128; ~85% of HBM roofline per measurements.
                       # For very large Cin/Cout on v7x (64 MiB VMEM), shrink it.


def same_padding1d(seq_len, ks, stride=1, dilation=1):
    """TF-style 'same' padding for 1D conv (mirrors the PyTorch module)."""
    p = (seq_len - 1) * stride + (ks - 1) * dilation + 1 - seq_len
    return (p // 2, p - p // 2)


def _round_up(x, m):
    return (x + m - 1) // m * m


def _conv1d_same_kernel(xm_ref, xh_ref, w_ref, b_ref, o_ref, *, ks, dilation, l_tile):
    """One (batch, L-tile) grid step.

    xm_ref: (1, Cin, l_tile)   main input window (VMEM, streamed per step)
    xh_ref: (1, Cin, 128)      right halo = next 128 input columns (VMEM)
    w_ref : (Cout, ks*Cin)     folded weight, resident across the grid (VMEM)
    b_ref : (1, Cout)          bias, resident across the grid (VMEM)
    o_ref : (1, Cout, l_tile)  lane-dense output tile (VMEM)
    """
    xw = jnp.concatenate([xm_ref[0], xh_ref[0]], axis=-1)       # (Cin, l_tile+128)

    # im2col: row (k*Cin + c) of the slab holds tap k of input channel c.
    # ks is small & static -> unrolled; each tap is a contiguous lane slice.
    taps = [xw[:, k * dilation: k * dilation + l_tile] for k in range(ks)]
    slab = jnp.concatenate(taps, axis=0)                        # (ks*Cin, l_tile)

    # Single MXU matmul with K = ks*Cin; native input dtype, f32 accumulation.
    acc = jnp.dot(w_ref[...], slab, preferred_element_type=jnp.float32)
    acc = acc + b_ref[0, :].astype(jnp.float32)[:, None]        # (Cout, l_tile)
    o_ref[0] = acc.astype(o_ref.dtype)


def conv1d_same(x, weight, bias, *, stride=1, dilation=1, l_tile=_DEFAULT_L_TILE):
    """Functional forward of Conv1dSame.

    x:      (N, Cin, L)
    weight: (Cout, Cin, ks)
    bias:   (Cout,)
    returns (N, Cout, L)   (module semantics: L_out == L for any stride/dilation)
    """
    N, Cin, L = x.shape
    Cout, Cin_w, ks = weight.shape
    assert Cin == Cin_w, "channel mismatch"
    assert (ks - 1) * dilation <= _HALO, (
        "receptive-field halo wider than 128 columns is not supported")

    pad_l, pad_r = same_padding1d(L, ks, stride=stride, dilation=dilation)
    L_out = L                               # this padding formula always yields L
    # stride handled by dense (stride-1) compute + wrapper downsample.
    dense_L = (L_out - 1) * stride + 1

    lt = max(128, min(_round_up(l_tile, 128), _round_up(dense_L, 128)))
    n_lt = pl.cdiv(dense_L, lt)
    L_in = n_lt * lt + _HALO                # padded input length incl. halo slack
    assert L_in - pad_l - L >= pad_r

    # One fused pad: TF-'same' left/right padding + tile alignment + halo slack.
    x_pad = jnp.pad(x, ((0, 0), (0, 0), (pad_l, L_in - pad_l - L)))

    # Fold taps into the contraction dim: w2d[f, k*Cin + c] == weight[f, c, k].
    w2d = jnp.transpose(weight, (0, 2, 1)).reshape(Cout, ks * Cin)
    b2d = bias.reshape(1, Cout)

    halo_blk = lt // _HALO                  # halo block-index multiplier along L

    kernel = functools.partial(_conv1d_same_kernel, ks=ks, dilation=dilation,
                               l_tile=lt)

    dense = pl.pallas_call(
        kernel,
        out_shape=jax.ShapeDtypeStruct((N, Cout, n_lt * lt), x.dtype),
        grid=(N, n_lt),
        in_specs=[
            # main window: element offset j * lt
            pl.BlockSpec((1, Cin, lt), lambda n, j: (n, 0, j)),
            # right halo: the next 128 columns, element offset (j + 1) * lt
            pl.BlockSpec((1, Cin, _HALO), lambda n, j: (n, 0, (j + 1) * halo_blk)),
            # weight / bias: constant index_map -> DMA'd once, stays in VMEM
            pl.BlockSpec((Cout, ks * Cin), lambda n, j: (0, 0)),
            pl.BlockSpec((1, Cout), lambda n, j: (0, 0)),
        ],
        out_specs=pl.BlockSpec((1, Cout, lt), lambda n, j: (n, 0, j)),
        compiler_params=pltpu.CompilerParams(
            # Independent output tiles on both axes -> shards across v7x's 2 TCs.
            dimension_semantics=("parallel", "parallel"),
            vmem_limit_bytes=32 * 1024 * 1024,
        ),
    )(x_pad, x_pad, w2d, b2d)

    if stride > 1:
        dense = dense[:, :, ::stride]
    return dense[:, :, :L_out]


def _reference_conv1d_same(x, weight, bias, *, stride=1, dilation=1):
    """Pure-JAX reference (mirrors F.conv1d on the ConstantPad1d'ed input)."""
    L = x.shape[-1]
    ks = weight.shape[-1]
    pad = same_padding1d(L, ks, stride=stride, dilation=dilation)
    out = jax.lax.conv_general_dilated(
        x.astype(jnp.float32),
        weight.astype(jnp.float32),
        window_strides=(stride,),
        padding=[pad],
        rhs_dilation=(dilation,),
        dimension_numbers=("NCH", "OIH", "NCH"),
    )
    return out + bias.astype(jnp.float32)[None, :, None]


if __name__ == "__main__":
    key = jax.random.PRNGKey(0)

    def run_case(idx, *, N, ni, nf, ks, stride, dilation, L):
        kx, kw, kb = jax.random.split(jax.random.fold_in(key, idx), 3)
        bound = 1.0 / (ni * ks) ** 0.5
        weight = jax.random.uniform(kw, (nf, ni, ks), jnp.float32, -bound, bound)
        bias = jax.random.uniform(kb, (nf,), jnp.float32, -bound, bound)
        x = jax.random.normal(kx, (N, ni, L), jnp.float32)

        out = conv1d_same(x, weight, bias, stride=stride, dilation=dilation)
        out = jax.block_until_ready(out)

        ref = _reference_conv1d_same(x, weight, bias, stride=stride, dilation=dilation)
        assert out.shape == (N, nf, L), (out.shape, (N, nf, L))
        err = float(jnp.max(jnp.abs(out - ref)))
        assert jnp.allclose(out, ref, atol=1e-5, rtol=1e-5), err

    # Module defaults (Conv1dSame(ni=4, nf=8, ks=3)) at small shapes.
    run_case(0, N=2, ni=4, nf=8, ks=3, stride=1, dilation=1, L=16)
    # Exercise the dilation>1 and stride>1 paths as well (previously untested).
    run_case(1, N=2, ni=4, nf=8, ks=3, stride=1, dilation=2, L=16)
    run_case(2, N=2, ni=4, nf=8, ks=5, stride=2, dilation=1, L=16)

    print("KERNEL_OK")
</pallas_src>

<mosaic_0001>
module attributes {stable_mosaic.version = 11 : i64} {
  func.func @_conv1d_same_kernel(%arg0: i32, %arg1: i32, %arg2: memref<1x4x128xf32, #tpu.memory_space<vmem>>, %arg3: memref<1x4x128xf32, #tpu.memory_space<vmem>>, %arg4: memref<8x12xf32, #tpu.memory_space<vmem>>, %arg5: memref<1x8xf32, #tpu.memory_space<vmem>>, %arg6: memref<1x8x128xf32, #tpu.memory_space<vmem>>) attributes {dimension_semantics = [#tpu.dimension_semantics<parallel>, #tpu.dimension_semantics<parallel>], iteration_bounds = array<i64: 2, 1>, scalar_prefetch = 0 : i64, scratch_operands = 0 : i64, tpu.core_type = #tpu.core_type<tc>, window_params = [{transform_indices = @transform_0, window_bounds = array<i64: 1, 4, 128>}, {transform_indices = @transform_1, window_bounds = array<i64: 1, 4, 128>}, {pipeline_mode = #tpu.pipeline_mode<synchronous>, transform_indices = @transform_2, window_bounds = array<i64: 8, 12>}, {pipeline_mode = #tpu.pipeline_mode<synchronous>, transform_indices = @transform_3, window_bounds = array<i64: 1, 8>}, {transform_indices = @transform_4, window_bounds = array<i64: 1, 8, 128>}]} {
    %c0 = arith.constant 0 : index
    %c0_0 = arith.constant 0 : index
    %c0_1 = arith.constant 0 : index
    %0 = vector.load %arg2[%c0, %c0_0, %c0_1] : memref<1x4x128xf32, #tpu.memory_space<vmem>>, vector<1x4x128xf32>
    %1 = vector.shape_cast %0 : vector<1x4x128xf32> to vector<4x128xf32>
    %c0_2 = arith.constant 0 : index
    %c0_3 = arith.constant 0 : index
    %c0_4 = arith.constant 0 : index
    %2 = vector.load %arg3[%c0_2, %c0_3, %c0_4] : memref<1x4x128xf32, #tpu.memory_space<vmem>>, vector<1x4x128xf32>
    %3 = vector.shape_cast %2 : vector<1x4x128xf32> to vector<4x128xf32>
    %4 = tpu.concatenate %1, %3 in 1 : vector<4x128xf32>, vector<4x128xf32> -> vector<4x256xf32>
    %5 = vector.extract_strided_slice %4 {offsets = [0, 0], sizes = [4, 128], strides = [1, 1]} : vector<4x256xf32> to vector<4x128xf32>
    %6 = vector.extract_strided_slice %4 {offsets = [0, 1], sizes = [4, 128], strides = [1, 1]} : vector<4x256xf32> to vector<4x128xf32>
    %7 = vector.extract_strided_slice %4 {offsets = [0, 2], sizes = [4, 128], strides = [1, 1]} : vector<4x256xf32> to vector<4x128xf32>
    %8 = tpu.concatenate %5, %6, %7 in 0 : vector<4x128xf32>, vector<4x128xf32>, vector<4x128xf32> -> vector<12x128xf32>
    %c0_5 = arith.constant 0 : index
    %c0_6 = arith.constant 0 : index
    %9 = vector.load %arg4[%c0_5, %c0_6] : memref<8x12xf32, #tpu.memory_space<vmem>>, vector<8x12xf32>
    %cst = arith.constant dense<0.000000e+00> : vector<8x128xf32>
    %10 = tpu.matmul %9, %8, %cst {dimension_numbers = #tpu.dot_dimension_numbers<[1], [0], [0], [1], [0, 0, 1, 1], [], []>} : vector<8x12xf32>, vector<12x128xf32>, vector<8x128xf32> -> vector<8x128xf32>
    %c0_7 = arith.constant 0 : index
    %c0_8 = arith.constant 0 : index
    %11 = vector.load %arg5[%c0_7, %c0_8] : memref<1x8xf32, #tpu.memory_space<vmem>>, vector<1x8xf32>
    %12 = vector.shape_cast %11 : vector<1x8xf32> to vector<8xf32>
    %13 = vector.shape_cast %12 : vector<8xf32> to vector<8x1xf32>
    %14 = vector.broadcast %13 : vector<8x1xf32> to vector<8x128xf32>
    %15 = arith.addf %10, %14 : vector<8x128xf32>
    %c0_9 = arith.constant 0 : index
    %c0_10 = arith.constant 0 : index
    %c0_11 = arith.constant 0 : index
    %16 = vector.load %arg6[%c0_9, %c0_10, %c0_11] : memref<1x8x128xf32, #tpu.memory_space<vmem>>, vector<1x8x128xf32>
    %17 = vector.shape_cast %16 : vector<1x8x128xf32> to vector<8x128xf32>
    %18 = vector.shape_cast %15 : vector<8x128xf32> to vector<1x8x128xf32>
    tpu.vector_store %arg6[%c0_9, %c0_10, %c0_11], %18 {strides = array<i32>} : memref<1x8x128xf32, #tpu.memory_space<vmem>>, vector<1x8x128xf32>,
    return
  }
  func.func @transform_0(%arg0: i32, %arg1: i32) -> (i32, i32, i32) {
    %c0_i32 = arith.constant 0 : i32
    %c0_i32_0 = arith.constant 0 : i32
    return %arg0, %c0_i32, %arg1 : i32, i32, i32
  }
  func.func @transform_1(%arg0: i32, %arg1: i32) -> (i32, i32, i32) {
    %c1_i32 = arith.constant 1 : i32
    %0 = arith.addi %arg1, %c1_i32 : i32
    %c1_i32_0 = arith.constant 1 : i32
    %1 = arith.muli %0, %c1_i32_0 : i32
    %c0_i32 = arith.constant 0 : i32
    %c0_i32_1 = arith.constant 0 : i32
    return %arg0, %c0_i32, %1 : i32, i32, i32
  }
  func.func @transform_2(%arg0: i32, %arg1: i32) -> (i32, i32) {
    %c0_i32 = arith.constant 0 : i32
    %c0_i32_0 = arith.constant 0 : i32
    %c0_i32_1 = arith.constant 0 : i32
    return %c0_i32, %c0_i32_0 : i32, i32
  }
  func.func @transform_3(%arg0: i32, %arg1: i32) -> (i32, i32) {
    %c0_i32 = arith.constant 0 : i32
    %c0_i32_0 = arith.constant 0 : i32
    %c0_i32_1 = arith.constant 0 : i32
    return %c0_i32, %c0_i32_0 : i32, i32
  }
  func.func @transform_4(%arg0: i32, %arg1: i32) -> (i32, i32, i32) {
    %c0_i32 = arith.constant 0 : i32
    %c0_i32_0 = arith.constant 0 : i32
    return %arg0, %c0_i32, %arg1 : i32, i32, i32
  }
}

</mosaic_0001>

<bundles_post_ra>
// kernel: tpu_custom_call.1
= control target key start
LH: loop header
LB: loop body
LE: loop exit
PB: predicated region body
PF: predicated region fallthrough
CT: control target
= control target key end

     0   :  { %s964_s0 = inlined_call_operand.hbm [shape: f32[2,4,256], index: 0, kind: input, shape index: {}]   ;;  %s965_s1 = inlined_call_operand.hbm [shape: f32[2,4,256], index: 1, kind: input, shape index: {}]   ;;  %s966_s2 = inlined_call_operand.hbm [shape: f32[8,12], index: 2, kind: input, shape index: {}]   ;;  %s967_s3 = inlined_call_operand.vmem [shape: f32[1,8], index: 3, kind: input, shape index: {}]   ;;  %s968_s4 = inlined_call_operand.hbm [shape: f32[2,8,128], index: 4, kind: output, shape index: {}]  }
   0x1   :  { %973 = sst [smem:[#allocation18_spill]] %s966_s2 }
   0x2   :  { %9 = vsyncpa [#allocation3], 0 }
   0x3   :  { %11 = vsyncpa [#allocation3 + $0x1], 0 }
   0x4   :  { %12 = vsyncpa [#allocation6], 0 }
   0x5   :  { %14 = vsyncpa [#allocation6 + $0x1], 0 }
   0x6   :  { %15 = vsyncpa [#allocation4], 0 }
   0x7   :  { %17 = vsyncpa [#allocation4 + $0x1], 0  ;;  %s806_s15 = smov 0   ;;  %s808_s16 = smov 0  }
   0x8   :  { %s810_s17 = smov 0   ;;  %s812_s18 = smov 0  }
   0x9   :  { %s814_s19 = smov 0   ;;  %s816_s20 = smov 0  }
   0xa LB: > { %974 = sst [smem:[#allocation13_spill]] %s764_s17  ;;  %s837_s21 = sadd.s32 4294967295, %s776_s20   ;;  %s776_s20 = sphi %s816_s20, %s23_s20   ;;  %s772_s19 = sphi %s814_s19, %s989_s19   ;;  %s768_s18 = sphi %s812_s18, %s988_s18   ;;  %s764_s17 = sphi %s810_s17, %s987_s17   ;;  %s760_s16 = sphi %s808_s16, %s991_s16   ;;  %s756_s15 = sphi %s806_s15, %s990_s15  }
   0xb   : > { %975 = sst [smem:[#allocation14_spill]] %s772_s19  ;;  %s485_s22 = sadd.s32 4294967294, %s776_s20  }
   0xc   : > { %p57_p0 = scmp.ne.s32.totalorder %s760_s16, %s756_s15  ;;  %p58_p1 = scmp.eq.s32.totalorder %s837_s21, 0 }
   0xd   : > { %p155_p2 = scmp.eq.s32.totalorder %s837_s21, 1  ;;  %p161_p3 = scmp.eq.s32.totalorder %s485_s22, 1 }
   0xe   : > { %p846_p4 = por %p58_p1, %p57_p0  ;;  %p486_p5 = scmp.ge.s32.totalorder %s776_s20, 1 }
   0xf   : > { %p851_p6 = por %p161_p3, %p57_p0  ;;  %p168_p7 = scmp.lt.s32.totalorder %s776_s20, 3 }
  0x10   : > { %s979_s2 = sld [smem:[#allocation18_spill]]  ;;  %p488_p9 = scmp.ge.s32.totalorder %s776_s20, 2 }
  0x11   : > { %s977_s24 = scalar_select %p851_p6, 1, 0 }
  0x12   : > { %p859_p8 = pnand %p486_p5, %p168_p7  ;;  %s778_s29 = smov [#allocation7]  }
  0x13   : > { %978 = sst [smem:[#allocation15_spill]] %s977_s24  ;;  %s182_s30 = sshll.u32 %s778_s29, 4  ;;  %s183_s30 = int_to_ptr.vmem [resolvable:$true] %s182_s30 }
  0x14   : > { %p518_p10 = pneg %p859_p8  ;;  %s35_s5 = sadd.s32 1, %s772_s19 }
  0x15   : > { %p37_p12 = scmp.ge.s32.totalorder %s35_s5, 2  ;;  %s44_s6 = sadd.s32 1, %s764_s17 }
  0x16   : > { %s180_s27 = sshll.u32 %s979_s2, 4  ;;  %p519_p11 = pnand %p518_p10, %p58_p1  ;;  %s181_s27 = int_to_ptr.hbm [resolvable:$true] %s180_s27 }
  0x17   : > { %p51_p13 = scmp.ne.s32.totalorder %s764_s17, %s760_s16  ;;  %p52_p0 = scmp.eq.s32.totalorder %s776_s20, 0 }
  0x18   : > { %521 = dma.hbm_to_vmem [thread:$0]  (!%p519_p11), %s181_s27, 128, %s183_s30, [#allocation6]  }
  0x19   : > { %s993_s5 = smov (%p37_p12, %s35_s5), 0  ;;  %p875_p3 = por %p52_p0, %p51_p13 }
  0x1a   : > { %981 = sst [smem:[#allocation16_spill]] %s993_s5  ;;  %p881_p5 = por %p155_p2, %p51_p13 }
  0x1b   : > { %s39_s9 = ssub.s32 %s772_s19, %s993_s5  ;;  %p534_p7 = scmp.lt.s32.totalorder %s776_s20, 2 }
  0x1c   : > { %p42_p10 = scmp.eq.s32.totalorder %s39_s9, 0  ;;  %s196_s10 = sand.u32 1, %s764_s17  }
  0x1d   : > { %s489_s11 = sshll.u32 %s196_s10, 2  ;;  %s506_s13 = sshll.u32 %s772_s19, 3 }
  0x1e   : > { %s890_s12 = scalar_select %p42_p10, %s764_s17, %s44_s6  }
  0x1f   : > { %s206_s25 = scalar_lea.hbm %s964_s0, %s506_s13  ;;  %s200_s26 = scalar_lea.vmem [#allocation2], %s489_s11 }
  0x20   : > { %984 = sst [smem:[#allocation17_spill]] %s890_s12  ;;  %s210_s27 = sshll.u32 %s200_s26, 4  ;;  %s211_s27 = int_to_ptr.vmem [resolvable:$true] %s210_s27 }
  0x21   : > { %s208_s29 = sshll.u32 %s206_s25, 4  ;;  %p523_p2 = pnand %p534_p7, %p875_p3  ;;  %s209_s29 = int_to_ptr.hbm [resolvable:$true] %s208_s29 }
  0x22   : > { %s408_s9 = scalar_lea.hbm %s965_s1, %s506_s13  ;;  %s217_s5 = sand.u32 1, %s776_s20  }
  0x23   : > { %s197_s24 = scalar_lea.sflag [#allocation3], %s196_s10  ;;  %s409_s6 = scalar_lea.hbm %s408_s9, 4 }
  0x24   : > { %525 = dma.hbm_to_vmem [thread:$0]  (!%p523_p2), %s209_s29, 64, %s211_s27, %s197_s24  }
  0x25   : > { %s230_s19 = sshll.u32 %s409_s6, 4  ;;  %s221_s12 = scalar_lea.vmem [#allocation5], %s489_s11  ;;  %s231_s19 = int_to_ptr.hbm [resolvable:$true] %s230_s19 }
  0x26   : > { %s232_s17 = sshll.u32 %s221_s12, 4  ;;  %s218_s14 = scalar_lea.sflag [#allocation6], %s217_s5  ;;  %s233_s17 = int_to_ptr.vmem [resolvable:$true] %s232_s17 }
  0x27   : > { %528 = dma.hbm_to_vmem [thread:$0]  (!%p523_p2), %s231_s19, 64, %s233_s17, %s218_s14  }
  0x28   : > { %241 = sbr.rel (%p859_p8) target bundleno = 311 (0x137), region = 36  ;;  %s905_s7 = sand.u32 (!%p859_p8), 1, %s760_s16  }
  0x29   : > { %s496_s2 = sshll.u32 (!%p859_p8), %s905_s7, 2  ;;  %s244_s10 = scalar_lea.sflag (!%p859_p8), [#allocation3], %s905_s7 }
  0x2a   : > { %s247_s24 = scalar_lea.vmem (!%p859_p8), [#allocation2], %s496_s2 }
  0x2d   : > { %739 = dma.done.wait (%p846_p4), %s244_s10, 64  }
  0x2e   : > { %741 = vsyncadd (%p846_p4), %s244_s10, 4294967232  ;;  %s253_s17 = sand.u32 1, %s837_s21   ;;  %s257_s28 = scalar_lea.vmem [#allocation5], %s496_s2 }
  0x2f   : > { %s254_s19 = scalar_lea.sflag [#allocation6], %s253_s17 }
  0x30   : > { %743 = dma.done.wait (%p846_p4), %s254_s19, 64  }
  0x31   : > { %745 = vsyncadd (%p846_p4), %s254_s19, 4294967232 }
  0x32   : > { %747 = dma.done.wait (%p58_p1), [#allocation6], 128  }
  0x33   : > { %749 = vsyncadd (%p58_p1), [#allocation6], 4294967168  ;;  %v294_v0 = vld [vmem:[%s247_s24] sm:$0xf]  ;;  %v295_v1 = vld [vmem:[%s257_s28] sm:$0xf]  ;;  %v318_v5 = vlaneseq }
  0x34   : > { %s779_s5 = smov 126   ;;  %v298_v2 = vrot.slane %v294_v0, 4  ;;  %v299_v3 = vrot.slane %v295_v1, 4  ;;  %s780_s11 = smov 127   ;;  %v595_v7 = vld [vmem:[%s967_s3] ss:$0 sm:$0xff] }
  0x35   : > { %307 = vrot.lane.b32.xlu0 %v294_v0, %s779_s5  ;;  %v319_v6 = vshrl.u32 %v318_v5, 7  ;;  %vm304_vm0 = vcmask 1039360   ;;  %vm311_vm1 = vcmask 1031168   ;;  %vm313_vm2 = vcmask 1043456   ;;  %v315_v16 = vld [vmem:[#allocation7] sm:$0xff]  ;;  %s499_s21 = sshll.u32 %s905_s7, 3 }
  0x36   : > { %v588_v4 = vpack.i.bf16 %v299_v3, %v298_v2  ;;  %vm324_vm3 = vcmask 97280   ;;  %s503_s13 = sshll.u32 %s768_s18, 3  ;;  %s292_s27 = scalar_lea.vmem [#allocation8], %s499_s21 }
  0x37   : > { %593 = vset.pattern.permute.xlu1 %v319_v6  ;;  %594 = vset.pattern.permute.xlu0 %v319_v6  ;;  %s363_s26 = scalar_lea.hbm %s968_s4, %s503_s13  ;;  %s365_s29 = sshll.u32 %s292_s27, 4  ;;  %s366_s29 = int_to_ptr.vmem [resolvable:$true] %s365_s29 }
  0x38   : > { %589 = vrot.lane.b32.xlu1 %v588_v4, %s780_s11  ;;  %s367_s30 = sshll.u32 %s363_s26, 4  ;;  %s352_s9 = scalar_lea.sflag [#allocation4], %s905_s7  ;;  %s368_s30 = int_to_ptr.hbm [resolvable:$true] %s367_s30 }
  0x39   : > { %s700_s6 = sshra.s32 %s368_s30, 4  ;;  %s706_s10 = scalar_lea.hbm %s968_s4, 16  ;;  %s701_s6 = int_to_ptr.hbm [resolvable:$true] %s700_s6 }
  0x3a   : > { %s702_s14 = scalar_lea.hbm %s701_s6, 8  ;;  %p707_p11 = scmp.lt.s32.totalorder %s701_s6, %s968_s4 }
  0x3b   : > { %p703_p1 = scmp.ne.s32.totalorder %s701_s6, %s702_s14  ;;  %p708_p12 = scmp.lt.s32.totalorder %s706_s10, %s702_s14 }
  0x3d   : > { %309 = vrot.lane.b32.xlu0 %v295_v1, %s779_s5  ;;  %p704_p4 = pnand %p703_p1, %p881_p5  ;;  %p709_p13 = por %p708_p12, %p707_p11 }
  0x3f   : > { %p705_p8 = pneg %p704_p4 }
  0x40   : > { %322 = vperm.xlu1 %593, %v595_v7  }
  0x41   : > { %p710_p0 = pnand %p709_p13, %p705_p8 }
  0xa7   : > { %v308_v8 = vpop.permute.xlu0 %307 }
  0xaa   : > { %v590_v9 = vpop.permute.xlu1 %589 }
  0xab   : > { %v592_v10 = vunpack.i.h.bf16 %v590_v9  ;;  %v591_v11 = vunpack.i.l.bf16 %v590_v9 }
  0xad   : > { %v305_v12 = vsel %vm304_vm0, %v591_v11, %v592_v10 }
  0xae   : > { %v314_v15 = vsel %vm313_vm2, %v294_v0, %v305_v12 }
  0xaf   : > { %v310_v13 = vpop.permute.xlu0 %309 }
  0xb0   : > { %v312_v14 = vsel %vm311_vm1, %v308_v8, %v310_v13 }
  0xb1   : > { %500 = vmatpush.msk.msra.mxu0 %vm313_vm2, %v312_v14 }
  0xb2   : > { %v323_v17 = vpop.permute.xlu1 %322 }
  0xb3   : > { %345 = vmatpush.msra.mxu0 %v314_v15 }
  0xb4   : > { %501 = vmatmul.msk.f32.vlgmr.msra.gmra.mxu0 %vm324_vm3, %v315_v16 }
 0x131   : > { %v347_v18 = vpop.f32.mrf.mxu0 }
 0x132   : > { %v348_v19 = vadd.f32 %v347_v18, %v323_v17 }
 0x134   : > { %350 = vst [vmem:[%s292_s27] sm:$0xff] %v348_v19 }
 0x135   : > { %713 = shalt.err (!%p710_p0)
}
 0x136   : > { %516 = dma.vmem_to_hbm [thread:$0]  (%p881_p5), %s366_s29, 128, %s368_s30, %s352_s9  }
 0x137 PF: > { %s379_s19 = sand.u32 1, %s756_s15   ;;  %p530_p3 = pnand %p488_p9, %p851_p6 }
 0x138   : > { %s380_s28 = scalar_lea.sflag [#allocation4], %s379_s19 }
 0x139   : > { %p531_p7 = pneg %p530_p3 }
 0x13b   : > { %751 = dma.done.wait (%p531_p7), %s380_s28, 128  }
 0x13c   : > { %753 = vsyncadd (%p531_p7), %s380_s28, 4294967168  ;;  %s23_s20 = sadd.s32 1, %s776_s20   ;;  %s986_s5 = sld [smem:[#allocation13_spill]] }
 0x13d   : > { %p20_p10 = scmp.ge.s32.totalorder %s23_s20, 4   ;;  %s987_s17 = sld [smem:[#allocation17_spill]] }
 0x13e   : > { %s988_s18 = sld [smem:[#allocation14_spill]]  ;;  %s990_s15 = smov %s760_s16 }
 0x13f   : > { %s989_s19 = sld [smem:[#allocation16_spill]]  ;;  %22 = sbr.rel (!%p20_p10) target bundleno = 10 (0xa), region = 98 }
 0x142   : > { %s991_s16 = smov %s986_s5 }
 0x144   :  { %386 = vsyncpa [#allocation3], 1 }
 0x145   :  { %388 = vsyncpa [#allocation3 + $0x1], 1 }
 0x146   :  { %389 = vsyncpa [#allocation6], 1 }
 0x147   :  { %391 = vsyncpa [#allocation6 + $0x1], 1 }
 0x148   :  { %392 = vsyncpa [#allocation4], 1 }
 0x149   :  { %394 = vsyncpa [#allocation4 + $0x1], 1 }

</bundles_post_ra>
